<compile_context>
chip_gen: v7x
topology: tpu7x:2x2x1
jax: 0.10.0
libtpu: 0.0.40
codegen_flags: <defaults>
</compile_context>

<pallas_src>
import math
from typing import NamedTuple

import jax
import jax.numpy as jnp
from jax.experimental import pallas as pl
from jax.experimental.pallas import tpu as pltpu


# ----------------------------------------------------------------------------
# Small helpers
# ----------------------------------------------------------------------------
def _round_up(x, m):
    return ((x + m - 1) // m) * m


def _cdiv(a, b):
    return (a + b - 1) // b


def _sublane(dtype):
    """Native sublane packing: 8 rows for 4-byte, 16 for 2-byte, 32 for 1-byte."""
    return max(8, 32 // jnp.dtype(dtype).itemsize)


def _vmem_capacity_bytes():
    """Physical VMEM per TensorCore; conservative fallback (v7x) if unknown."""
    try:
        cap = getattr(pltpu.get_tpu_info(), "vmem_capacity_bytes", None)
        if cap:
            return int(cap)
    except Exception:
        pass
    return 64 * 1024 * 1024


def _pick_tile(extent, granule, tile_max):
    """Pick (tile, padded_extent, grid) so tile divides padded_extent exactly,
    tile is a multiple of `granule`, tile <= tile_max, and padding waste is at
    most one granule per tile (no blow-up from rounding extents to a tile)."""
    ext = _round_up(max(int(extent), 1), granule)
    tile_max = max(granule, _round_up(min(int(tile_max), ext), granule))
    grid = _cdiv(ext, tile_max)
    tile = _round_up(_cdiv(ext, grid), granule)
    return tile, tile * grid, grid


def _fit_tiles_to_budget(tm, tn, tk, isz_in, isz_out, budget):
    """Shrink tile maxima until the double-buffered footprint fits `budget`."""
    def footprint(tm, tn, tk):
        return (2 * (tm * tk + tk * tn) * isz_in      # x + w tiles, double-buffered
                + 2 * tm * tn * isz_out               # output tiles, double-buffered
                + tm * tn * 4                         # f32 accumulator (worst case)
                + 2 * tn * 4)                         # bias tiles

    while footprint(tm, tn, tk) > budget:
        if tk >= max(tm, tn) and tk > 128:
            tk //= 2
        elif tn >= tm and tn > 128:
            tn //= 2
        elif tm > 8:
            tm //= 2
        else:
            break
    return tm, tn, tk


# ----------------------------------------------------------------------------
# Kernels
# ----------------------------------------------------------------------------
def _linear_kernel_noacc(x_ref, w_ref, b_ref, o_ref):
    """Single-K-tile fast path: one fused dot + bias store, no scratch.

    x_ref: (tm, K)   w_ref: (K, tn)   b_ref: (1, tn)   o_ref: (tm, tn)
    """
    acc = jnp.dot(x_ref[...], w_ref[...], preferred_element_type=jnp.float32)
    o_ref[...] = (acc + b_ref[...].astype(jnp.float32)).astype(o_ref.dtype)


def _linear_kernel_accum(x_ref, w_ref, b_ref, o_ref, acc_ref):
    """Multi-K-tile path: f32 VMEM accumulator over the (sequential) K axis.

    x_ref: (tm, tk)  w_ref: (tk, tn)  b_ref: (1, tn)  o_ref/acc_ref: (tm, tn)
    """
    k = pl.program_id(2)

    @pl.when(k == 0)
    def _():
        acc_ref[...] = jnp.zeros_like(acc_ref)

    acc_ref[...] += jnp.dot(x_ref[...], w_ref[...],
                            preferred_element_type=jnp.float32)

    @pl.when(k == pl.num_programs(2) - 1)
    def _():
        o_ref[...] = (acc_ref[...] + b_ref[...].astype(jnp.float32)
                      ).astype(o_ref.dtype)


# ----------------------------------------------------------------------------
# Parameter preparation (one-time, outside the hot path)
# ----------------------------------------------------------------------------
class PreparedLinear(NamedTuple):
    w: jax.Array          # (k_pad, n_pad), pre-transposed, pre-padded, compute dtype
    b: jax.Array          # (1, n_pad), float32
    n_valid: int
    k_valid: int
    tn: int
    tk: int
    tm_max: int
    vmem_cap: int


def prepare_linear_params(w, b, *, compute_dtype=None,
                          tm_max=512, tn_max=512, tk_max=1024):
    """Pre-transpose W to (In, Out), pad to tile multiples, and (optionally)
    cast to a narrower compute dtype — all done once at parameter-prep time so
    the per-call forward never rewrites W in HBM."""
    output_dim, input_dim = w.shape
    assert b.shape == (output_dim,), b.shape

    compute_dtype = jnp.dtype(compute_dtype if compute_dtype is not None else w.dtype)
    isz = compute_dtype.itemsize
    if isz < 4:                      # same byte footprint -> deeper K tiles for bf16/int8
        tk_max = tk_max * (4 // isz)

    vmem_cap = _vmem_capacity_bytes()
    # Leave headroom for compiler-internal scratch; ~26 MiB on v7x, 48 MiB elsewhere.
    budget = max(8 * 1024 * 1024,
                 min(vmem_cap // 2 - 6 * 1024 * 1024, 48 * 1024 * 1024))
    tm_max, tn_max, tk_max = _fit_tiles_to_budget(tm_max, tn_max, tk_max,
                                                  isz, 4, budget)

    tn, n_pad, _ = _pick_tile(output_dim, 128, tn_max)
    tk, k_pad, _ = _pick_tile(input_dim, 128, tk_max)

    wt = jnp.transpose(w)                         # (In, Out): K on sublanes, MXU-native
    if (k_pad, n_pad) != (input_dim, output_dim):
        wt = jnp.pad(wt, ((0, k_pad - input_dim), (0, n_pad - output_dim)))
    wt = wt.astype(compute_dtype)

    bp = b.astype(jnp.float32)
    if n_pad != output_dim:
        bp = jnp.pad(bp, (0, n_pad - output_dim))
    bp = bp.reshape(1, n_pad)

    return PreparedLinear(w=wt, b=bp, n_valid=output_dim, k_valid=input_dim,
                          tn=tn, tk=tk, tm_max=tm_max, vmem_cap=vmem_cap)


# ----------------------------------------------------------------------------
# Forward
# ----------------------------------------------------------------------------
def linear_forward(x, params: PreparedLinear):
    """Forward pass of Linear: x @ W.T + b, using pre-prepared params.

    x: (batch, input_dim); returns (batch, output_dim) in x.dtype.
    """
    batch, input_dim = x.shape
    assert input_dim == params.k_valid, (input_dim, params.k_valid)

    k_pad, n_pad = params.w.shape
    compute_dtype = params.w.dtype
    out_dtype = x.dtype
    isz_c = jnp.dtype(compute_dtype).itemsize
    isz_o = jnp.dtype(out_dtype).itemsize

    # Dtype-aware sublane rounding for the batch axis.
    sublane = _sublane(compute_dtype)
    tm, m_pad, gm = _pick_tile(batch, sublane, params.tm_max)

    tn, tk = params.tn, params.tk
    gn, gk = n_pad // tn, k_pad // tk

    # v7x megacore: when the GEMV-like regime collapses the M grid, split N so
    # both TensorCores get a parallel block (harmless no-op on v5e/v6e).
    if gm == 1 and gn == 1 and n_pad % 256 == 0:
        tn, gn = n_pad // 2, 2

    # Hot path only ever touches x: pad (batch/K) and cast to the compute dtype.
    xp = x
    if (m_pad, k_pad) != (batch, input_dim):
        xp = jnp.pad(xp, ((0, m_pad - batch), (0, k_pad - input_dim)))
    if xp.dtype != compute_dtype:
        xp = xp.astype(compute_dtype)

    # VMEM accounting: double-buffered tiles (+ f32 accumulator when gk > 1).
    footprint = (2 * (tm * tk + tk * tn) * isz_c
                 + 2 * tm * tn * isz_o
                 + (tm * tn * 4 if gk > 1 else 0)
                 + 2 * tn * 4)
    vmem_limit = int(min(0.7 * params.vmem_cap,
                         max(32 * 1024 * 1024, footprint + 16 * 1024 * 1024)))

    # Honest traffic estimate: X re-read per N block, W re-read per M block.
    cost = pl.CostEstimate(
        flops=2 * m_pad * n_pad * k_pad,
        transcendentals=0,
        bytes_accessed=int(m_pad * k_pad * isz_c * gn
                           + k_pad * n_pad * isz_c * gm
                           + n_pad * 4 * gm
                           + m_pad * n_pad * isz_o),
    )

    if gk == 1:
        # K fits in one tile: no accumulator, no init/epilogue branches.
        grid = (gm, gn)
        in_specs = [
            pl.BlockSpec((tm, tk), lambda i, j: (i, 0)),   # activations
            pl.BlockSpec((tk, tn), lambda i, j: (0, j)),   # weights (In, Out)
            pl.BlockSpec((1, tn), lambda i, j: (0, j)),    # bias
        ]
        out_specs = pl.BlockSpec((tm, tn), lambda i, j: (i, j))
        scratch_shapes = []
        kernel = _linear_kernel_noacc
        dims = ("parallel", "parallel")
    else:
        grid = (gm, gn, gk)
        in_specs = [
            pl.BlockSpec((tm, tk), lambda i, j, k: (i, k)),
            pl.BlockSpec((tk, tn), lambda i, j, k: (k, j)),
            pl.BlockSpec((1, tn), lambda i, j, k: (0, j)),
        ]
        out_specs = pl.BlockSpec((tm, tn), lambda i, j, k: (i, j))
        scratch_shapes = [pltpu.VMEM((tm, tn), jnp.float32)]
        kernel = _linear_kernel_accum
        dims = ("parallel", "parallel", "arbitrary")

    out_padded = pl.pallas_call(
        kernel,
        out_shape=jax.ShapeDtypeStruct((m_pad, n_pad), out_dtype),
        grid_spec=pltpu.PrefetchScalarGridSpec(
            num_scalar_prefetch=0,
            grid=grid,
            in_specs=in_specs,
            out_specs=out_specs,
            scratch_shapes=scratch_shapes,
        ),
        compiler_params=pltpu.CompilerParams(
            dimension_semantics=dims,
            vmem_limit_bytes=vmem_limit,
        ),
        cost_estimate=cost,
    )(xp, params.w, params.b)

    if m_pad == batch and n_pad == params.n_valid:
        return out_padded
    return out_padded[:batch, :params.n_valid]


# ----------------------------------------------------------------------------
# Self-test
# ----------------------------------------------------------------------------
if __name__ == "__main__":
    # Small shapes consistent with Linear(input_dim, output_dim).
    batch, input_dim, output_dim = 8, 32, 16

    key = jax.random.PRNGKey(0)
    kx, kw, kb = jax.random.split(key, 3)

    # Deterministic Xavier-style init, matching the module's __init__.
    std = math.sqrt(2.0 / (output_dim + input_dim))
    x = jax.random.normal(kx, (batch, input_dim), dtype=jnp.float32)
    w = std * jax.random.normal(kw, (output_dim, input_dim), dtype=jnp.float32)
    b = jax.random.uniform(kb, (output_dim,), dtype=jnp.float32,
                           minval=-std, maxval=std)

    ref = x @ w.T + b

    # 1) f32 compute path — exact parity with the reference module.
    p_f32 = prepare_linear_params(w, b)
    out = linear_forward(x, p_f32)
    jax.block_until_ready(out)
    assert out.shape == (batch, output_dim), out.shape
    assert jnp.allclose(out, ref, atol=1e-5, rtol=1e-5), "f32 path mismatch"

    # 2) bf16 inputs + f32 accumulation (MXU-peak config on v6e/v7x) — relaxed tol.
    p_bf16 = prepare_linear_params(w, b, compute_dtype=jnp.bfloat16)
    out_bf = linear_forward(x, p_bf16)
    jax.block_until_ready(out_bf)
    assert jnp.allclose(out_bf, ref, atol=5e-2, rtol=5e-2), "bf16 path mismatch"

    # 3) Multi-K-tile accumulator path (forced with tiny tile maxima).
    x2 = jax.random.normal(kx, (24, 384), dtype=jnp.float32)
    w2 = 0.05 * jax.random.normal(kw, (96, 384), dtype=jnp.float32)
    b2 = jax.random.uniform(kb, (96,), dtype=jnp.float32, minval=-0.05, maxval=0.05)
    p2 = prepare_linear_params(w2, b2, tm_max=16, tn_max=128, tk_max=128)
    out2 = linear_forward(x2, p2)
    jax.block_until_ready(out2)
    ref2 = x2 @ w2.T + b2
    assert out2.shape == (24, 96), out2.shape
    assert jnp.allclose(out2, ref2, atol=1e-3, rtol=1e-3), "accum path mismatch"

    print("KERNEL_OK")
</pallas_src>

<mosaic_0001>
module attributes {stable_mosaic.version = 11 : i64} {
  func.func @_linear_kernel_noacc(%arg0: i32, %arg1: i32, %arg2: memref<8x128xf32, #tpu.memory_space<vmem>>, %arg3: memref<128x128xf32, #tpu.memory_space<vmem>>, %arg4: memref<1x128xf32, #tpu.memory_space<vmem>>, %arg5: memref<8x128xf32, #tpu.memory_space<vmem>>) attributes {dimension_semantics = [#tpu.dimension_semantics<parallel>, #tpu.dimension_semantics<parallel>], iteration_bounds = array<i64: 1, 1>, scalar_prefetch = 0 : i64, scratch_operands = 0 : i64, tpu.core_type = #tpu.core_type<tc>, window_params = [{transform_indices = @transform_0, window_bounds = array<i64: 8, 128>}, {transform_indices = @transform_1, window_bounds = array<i64: 128, 128>}, {transform_indices = @transform_2, window_bounds = array<i64: 1, 128>}, {transform_indices = @transform_3, window_bounds = array<i64: 8, 128>}]} {
    %c0 = arith.constant 0 : index
    %c0_0 = arith.constant 0 : index
    %0 = vector.load %arg2[%c0, %c0_0] : memref<8x128xf32, #tpu.memory_space<vmem>>, vector<8x128xf32>
    %c0_1 = arith.constant 0 : index
    %c0_2 = arith.constant 0 : index
    %1 = vector.load %arg3[%c0_1, %c0_2] : memref<128x128xf32, #tpu.memory_space<vmem>>, vector<128x128xf32>
    %cst = arith.constant dense<0.000000e+00> : vector<8x128xf32>
    %2 = tpu.matmul %0, %1, %cst {dimension_numbers = #tpu.dot_dimension_numbers<[1], [0], [0], [1], [0, 0, 1, 1], [], []>} : vector<8x128xf32>, vector<128x128xf32>, vector<8x128xf32> -> vector<8x128xf32>
    %c0_3 = arith.constant 0 : index
    %c0_4 = arith.constant 0 : index
    %3 = vector.load %arg4[%c0_3, %c0_4] : memref<1x128xf32, #tpu.memory_space<vmem>>, vector<1x128xf32>
    %4 = vector.broadcast %3 : vector<1x128xf32> to vector<8x128xf32>
    %5 = arith.addf %2, %4 : vector<8x128xf32>
    %c0_5 = arith.constant 0 : index
    %c0_6 = arith.constant 0 : index
    %6 = vector.load %arg5[%c0_5, %c0_6] : memref<8x128xf32, #tpu.memory_space<vmem>>, vector<8x128xf32>
    tpu.vector_store %arg5[%c0_5, %c0_6], %5 {strides = array<i32>} : memref<8x128xf32, #tpu.memory_space<vmem>>, vector<8x128xf32>,
    return
  }
  func.func @transform_0(%arg0: i32, %arg1: i32) -> (i32, i32) {
    %c0_i32 = arith.constant 0 : i32
    %c0_i32_0 = arith.constant 0 : i32
    return %arg0, %c0_i32 : i32, i32
  }
  func.func @transform_1(%arg0: i32, %arg1: i32) -> (i32, i32) {
    %c0_i32 = arith.constant 0 : i32
    %c0_i32_0 = arith.constant 0 : i32
    return %c0_i32, %arg1 : i32, i32
  }
  func.func @transform_2(%arg0: i32, %arg1: i32) -> (i32, i32) {
    %c0_i32 = arith.constant 0 : i32
    %c0_i32_0 = arith.constant 0 : i32
    return %c0_i32, %arg1 : i32, i32
  }
  func.func @transform_3(%arg0: i32, %arg1: i32) -> (i32, i32) {
    %c0_i32 = arith.constant 0 : i32
    return %arg0, %arg1 : i32, i32
  }
}

</mosaic_0001>

<bundles_post_ra>
// kernel: tpu_custom_call.1
= control target key start
LH: loop header
LB: loop body
LE: loop exit
PB: predicated region body
PF: predicated region fallthrough
CT: control target
= control target key end

     0   :  { %8 = vsyncpa [#allocation3], 0  ;;  %s383_s0 = inlined_call_operand.hbm [shape: f32[8,128], index: 0, kind: input, shape index: {}]   ;;  %s384_s1 = inlined_call_operand.hbm [shape: f32[128,128], index: 1, kind: input, shape index: {}]   ;;  %s385_s2 = inlined_call_operand.vmem [shape: f32[1,128], index: 2, kind: input, shape index: {}]   ;;  %s386_s3 = inlined_call_operand.hbm [shape: f32[8,128], index: 3, kind: output, shape index: {}]  }
   0x1   :  { %9 = vsyncpa [#allocation6], 0 }
   0x2   :  { %10 = vsyncpa [#allocation4], 0  ;;  %s309_s12 = smov [#allocation2]   ;;  %s310_s14 = smov [#allocation5]  }
   0x3   :  { %s17_s13 = sshll.u32 %s309_s12, 4  ;;  %s26_s15 = sshll.u32 %s310_s14, 4  ;;  %s18_s13 = int_to_ptr.vmem [resolvable:$true] %s17_s13  ;;  %s337_s15 = int_to_ptr.vmem [resolvable:$true] %s26_s15 }
   0x4   :  { %s237_s18 = scalar_lea.hbm %s383_s0, 128 }
   0x5   :  { %p238_p0 = scmp.ne.s32.totalorder %s383_s0, %s237_s18  ;;  %p241_p1 = scmp.lt.u32.totalorder %s237_s18, %s383_s0 }
   0x7   :  { %p243_p2 = pnand %p241_p1, %p238_p0 }
   0x9   :  { %246 = shalt.err (!%p243_p2)
}
   0xa   :  { %s247_s23 = scalar_lea.vmem %s18_s13, 128  ;;  %p252_p4 = scmp.lt.s32.totalorder %s18_s13, %s18_s13 }
   0xb   :  { %p248_p3 = scmp.ne.s32.totalorder %s18_s13, %s247_s23  ;;  %p253_p5 = scmp.lt.s32.totalorder %s247_s23, %s247_s23 }
   0xd   :  { %p254_p6 = por %p253_p5, %p252_p4 }
   0xf   :  { %p255_p7 = pnand %p254_p6, %p248_p3 }
  0x11   :  { %258 = shalt.err (!%p255_p7)
}
  0x12   :  { %20 = dma.hbm_to_vmem [thread:$0]  %s383_s0, 128, %s18_s13, [#allocation3]  }
  0x13   :  { %s259_s28 = scalar_lea.hbm %s384_s1, 2048 }
  0x14   :  { %p260_p8 = scmp.ne.s32.totalorder %s384_s1, %s259_s28  ;;  %p263_p9 = scmp.lt.u32.totalorder %s259_s28, %s384_s1 }
  0x16   :  { %p265_p10 = pnand %p263_p9, %p260_p8 }
  0x18   :  { %268 = shalt.err (!%p265_p10)
}
  0x19   :  { %s269_s6 = scalar_lea.vmem %s337_s15, 2048  ;;  %p274_p12 = scmp.lt.s32.totalorder %s337_s15, %s337_s15 }
  0x1a   :  { %p270_p11 = scmp.ne.s32.totalorder %s337_s15, %s269_s6  ;;  %p275_p13 = scmp.lt.s32.totalorder %s269_s6, %s269_s6 }
  0x1c   :  { %p276_p0 = por %p275_p13, %p274_p12 }
  0x1e   :  { %p277_p1 = pnand %p276_p0, %p270_p11 }
  0x20   :  { %280 = shalt.err (!%p277_p1)
}
  0x21   :  { %s311_s0 = smov 128   ;;  %s312_s7 = smov 8  }
  0x22   :  { %32 = dma.hbm_to_vmem [thread:$0]  %s384_s1, 2048, %s337_s15, [#allocation6], %s311_s0, %s311_s0, %s312_s7  }
  0x23   :  { %303 = dma.done.wait [#allocation3], 128  }
  0x24   :  { %304 = vsyncadd [#allocation3], 4294967168 }
  0x25   :  { %305 = dma.done.wait [#allocation6], 2048  }
  0x26   :  { %306 = vsyncadd [#allocation6], 4294965248  ;;  %v313_v0 = vmov 0.0|0.0   ;;  %vm314_vm0 = vmmov 0   ;;  %v315_v1 = vmov 0.0   ;;  %v42_v2 = vld [vmem:[#allocation5] sm:$0xff] }
  0x27   :  { %205 = vmatprep.subr.bf16.mxu0 %v313_v0  ;;  %202 = vmatprep.mubr.msk.f32.mxu0 %vm314_vm0, %v315_v1  ;;  %v43_v3 = vld [vmem:[#allocation5 + $0x8] sm:$0xff]  ;;  %v44_v4 = vld [vmem:[#allocation5 + $0x10] sm:$0xff]  ;;  %v45_v6 = vld [vmem:[#allocation5 + $0x18] sm:$0xff]  ;;  %s316_s11 = smov [#allocation7]  }
  0x28   :  { %v206_v5 = vpack.c.bf16 %v43_v3, %v42_v2  ;;  %v209_v7 = vpack.c.bf16 %v45_v6, %v44_v4  ;;  %v46_v8 = vld [vmem:[#allocation5 + $0x20] sm:$0xff]  ;;  %v47_v9 = vld [vmem:[#allocation5 + $0x28] sm:$0xff]  ;;  %v48_v11 = vld [vmem:[#allocation5 + $0x30] sm:$0xff]  ;;  %s142_s12 = sshll.u32 %s316_s11, 4  ;;  %s143_s12 = int_to_ptr.vmem [resolvable:$true] %s142_s12 }
  0x29   :  { %v212_v10 = vpack.c.bf16 %v47_v9, %v46_v8  ;;  %v49_v12 = vld [vmem:[#allocation5 + $0x38] sm:$0xff]  ;;  %v50_v14 = vld [vmem:[#allocation5 + $0x40] sm:$0xff]  ;;  %v51_v15 = vld [vmem:[#allocation5 + $0x48] sm:$0xff]  ;;  %s281_s13 = scalar_lea.vmem %s143_s12, 128  ;;  %p286_p3 = scmp.lt.s32.totalorder %s143_s12, %s143_s12 }
  0x2a   :  { %207 = vmatpush3.bf16.msra.mxu0 %v206_v5  ;;  %v215_v13 = vpack.c.bf16 %v49_v12, %v48_v11  ;;  %v218_v16 = vpack.c.bf16 %v51_v15, %v50_v14  ;;  %v52_v17 = vld [vmem:[#allocation5 + $0x50] sm:$0xff]  ;;  %v53_v18 = vld [vmem:[#allocation5 + $0x58] sm:$0xff]  ;;  %v54_v20 = vld [vmem:[#allocation5 + $0x60] sm:$0xff]  ;;  %p282_p2 = scmp.ne.s32.totalorder %s143_s12, %s281_s13  ;;  %p287_p4 = scmp.lt.s32.totalorder %s281_s13, %s281_s13 }
  0x2b   :  { %208 = vmatprep.subr.bf16.mxu0 %v313_v0  ;;  %v221_v19 = vpack.c.bf16 %v53_v18, %v52_v17  ;;  %v55_v21 = vld [vmem:[#allocation5 + $0x68] sm:$0xff]  ;;  %v56_v23 = vld [vmem:[#allocation5 + $0x70] sm:$0xff]  ;;  %v57_v24 = vld [vmem:[#allocation5 + $0x78] sm:$0xff] }
  0x2c   :  { %v224_v22 = vpack.c.bf16 %v55_v21, %v54_v20  ;;  %v227_v25 = vpack.c.bf16 %v57_v24, %v56_v23  ;;  %v41_v26 = vld [vmem:[#allocation2] sm:$0xff]  ;;  %p288_p5 = por %p287_p4, %p286_p3 }
  0x2d   :  { %v152_v27 = vld [vmem:[%s385_s2] ss:$0 sm:$0xff] }
  0x2e   :  { %210 = vmatpush3.bf16.msra.mxu0 %v209_v7  ;;  %p289_p6 = pnand %p288_p5, %p282_p2 }
  0x2f   :  { %211 = vmatprep.subr.bf16.mxu0 %v313_v0 }
  0x32   :  { %213 = vmatpush3.bf16.msra.mxu0 %v212_v10 }
  0x33   :  { %214 = vmatprep.subr.bf16.mxu0 %v313_v0 }
  0x36   :  { %216 = vmatpush3.bf16.msra.mxu0 %v215_v13 }
  0x37   :  { %217 = vmatprep.subr.bf16.mxu0 %v313_v0 }
  0x3a   :  { %219 = vmatpush3.bf16.msra.mxu0 %v218_v16 }
  0x3b   :  { %220 = vmatprep.subr.bf16.mxu0 %v313_v0 }
  0x3e   :  { %222 = vmatpush3.bf16.msra.mxu0 %v221_v19 }
  0x3f   :  { %223 = vmatprep.subr.bf16.mxu0 %v313_v0 }
  0x42   :  { %225 = vmatpush3.bf16.msra.mxu0 %v224_v22 }
  0x43   :  { %226 = vmatprep.subr.bf16.mxu0 %v313_v0 }
  0x46   :  { %228 = vmatpush3.bf16.msra.mxu0 %v227_v25 }
  0x49   :  { %203 = vmatmul.mubr.f32.vlgmr.msra.gmra.mrb[0].mxu0 %v41_v26 }
 0x11c   :  { %v131_v28 = vpop.f32.mrb[0].mxu0 }
 0x11d   :  { %v132_v29 = vadd.f32 %v152_v27, %v131_v28  ;;  %v204_v30 = vpop.f32.mrb[1].mxu0 }
 0x11f   :  { %135 = vst [vmem:[#allocation7] sm:$0xff] %v132_v29 }
 0x120   :  { %292 = shalt.err (!%p289_p6)
}
 0x121   :  { %s293_s16 = scalar_lea.hbm %s386_s3, 128 }
 0x122   :  { %p294_p7 = scmp.ne.s32.totalorder %s386_s3, %s293_s16  ;;  %p297_p8 = scmp.lt.u32.totalorder %s293_s16, %s386_s3 }
 0x124   :  { %p299_p9 = pnand %p297_p8, %p294_p7 }
 0x126   :  { %302 = shalt.err (!%p299_p9)
}
 0x127   :  { %145 = dma.vmem_to_hbm [thread:$0]  %s143_s12, 128, %s386_s3, [#allocation4]  }
 0x128   :  { %307 = dma.done.wait [#allocation4], 128  }
 0x129   :  { %308 = vsyncadd [#allocation4], 4294967168 }
 0x12a   :  { %149 = vsyncpa [#allocation3], 1 }
 0x12b   :  { %150 = vsyncpa [#allocation6], 1 }
 0x12c   :  { %151 = vsyncpa [#allocation4], 1 }

</bundles_post_ra>
